<compile_context>
chip_gen: v7x
topology: tpu7x:2x2x1
jax: 0.10.0
libtpu: 0.0.40
codegen_flags: <defaults>
</compile_context>

<pallas_src>
import functools

import jax
import jax.numpy as jnp
from jax.experimental import pallas as pl
from jax.experimental.pallas import tpu as pltpu

# ----- "cfg" constants (small, synthetic) ------------------------------------
POOLER_RESOLUTION = 4       # cfg.MODEL.ROI_IOU_HEAD.POOLER_RESOLUTION
POOLER_SCALES = (0.25,)     # cfg.MODEL.ROI_IOU_HEAD.POOLER_SCALES (single level)
SAMPLING_RATIO = 2          # ROIAlign sampling ratio
MLP_HEAD_DIM = 32           # cfg.MODEL.ROI_IOU_HEAD.MLP_HEAD_DIM
# TODO(synk): multi-level FPN pooling (LevelMapper over several scales) not
# implemented; a single pyramid level is used here.

_LANES = 128
_SUBLANES = 8


def _round_up(x, m):
    return ((x + m - 1) // m) * m


# -----------------------------------------------------------------------------
# ROIAlign as interpolation-matrix matmuls (gather-free, runs on the MXU).
# -----------------------------------------------------------------------------
def _interp_matrix(start, extent, size, R, S):
    """Sample-averaged separable bilinear interpolation matrix, shape [R, size]."""
    bin_sz = extent / R
    p = jnp.arange(R, dtype=jnp.float32)
    s = (jnp.arange(S, dtype=jnp.float32) + 0.5) / S
    coords = start + (p[:, None] + s[None, :]) * bin_sz            # [R, S]
    valid = (coords > -1.0) & (coords < size)
    cc = jnp.clip(coords, 0.0, size - 1.0)
    grid = jnp.arange(size, dtype=jnp.float32)
    w = jnp.maximum(0.0, 1.0 - jnp.abs(cc[:, :, None] - grid))     # [R, S, size]
    w = jnp.where(valid[:, :, None], w, 0.0)
    return w.sum(axis=1) / S                                       # [R, size]


def _roi_matrices(box, H, W, R, S, scale):
    x1 = box[0] * scale
    y1 = box[1] * scale
    x2 = box[2] * scale
    y2 = box[3] * scale
    roi_w = jnp.maximum(x2 - x1, 1.0)
    roi_h = jnp.maximum(y2 - y1, 1.0)
    Ay = _interp_matrix(y1, roi_h, H, R, S)    # [R, H]
    Ax = _interp_matrix(x1, roi_w, W, R, S)    # [R, W]
    return Ay, Ax


def pooler_fn(feats, proposals_per_image):
    """feats: list with one level [B,C,H,W]; proposals: list of [Ki,4] xyxy
    boxes in image coordinates. Returns pooled features [K, C, R, R]."""
    level = feats[0]
    B, C, H, W = level.shape
    R, S, scale = POOLER_RESOLUTION, SAMPLING_RATIO, POOLER_SCALES[0]
    make_mats = jax.vmap(
        functools.partial(_roi_matrices, H=H, W=W, R=R, S=S, scale=scale))
    pooled = []
    for b, boxes in enumerate(proposals_per_image):
        Ay, Ax = make_mats(boxes)                                   # [Kb,R,H],[Kb,R,W]
        img = level[b]                                              # [C, H, W]
        tmp = jnp.einsum('krh,chw->kcrw', Ay, img)                  # [Kb,C,R,W]
        pooled.append(jnp.einsum('kcrw,ksw->kcrs', tmp, Ax))        # [Kb,C,R,R]
    return jnp.concatenate(pooled, axis=0)                          # [K, C, R, R]


# -----------------------------------------------------------------------------
# Pallas fused MLP head: relu(relu(x@W1+b1)@W2+b2), bf16 operands / f32 accum.
# -----------------------------------------------------------------------------
def _mlp_kernel(x_ref, w1_ref, b1_ref, w2_ref, b2_ref, o_ref):
    h = jnp.dot(x_ref[...], w1_ref[...], preferred_element_type=jnp.float32)
    h = jnp.maximum(h + b1_ref[...], 0.0)                           # fc6_iou + ReLU (f32)
    h2 = jnp.dot(h.astype(w2_ref.dtype), w2_ref[...],
                 preferred_element_type=jnp.float32)
    o_ref[...] = jnp.maximum(h2 + b2_ref[...], 0.0).astype(o_ref.dtype)  # fc7 + ReLU


def mlp_head(x, w1, b1, w2, b2, *, tile_n=256):
    K, F_in = x.shape
    rep = w1.shape[1]
    # Lane-pad the contraction and output dims to 128 (zeros => exact results
    # after the final column slice). Gives full-vreg loads and unmasked stores.
    F_pad = _round_up(F_in, _LANES)
    R_pad = _round_up(rep, _LANES)
    xb = jnp.pad(x, ((0, 0), (0, F_pad - F_in))).astype(jnp.bfloat16)
    w1b = jnp.pad(w1, ((0, F_pad - F_in), (0, R_pad - rep))).astype(jnp.bfloat16)
    b1p = jnp.pad(b1, ((0, 0), (0, R_pad - rep)))
    w2b = jnp.pad(w2, ((0, R_pad - rep), (0, R_pad - rep))).astype(jnp.bfloat16)
    b2p = jnp.pad(b2, ((0, 0), (0, R_pad - rep)))

    # Big row tile to amortize per-step overhead; capped so tiny K is 1 step.
    tn = min(_round_up(tile_n, _SUBLANES), _round_up(K, _SUBLANES))
    grid = (pl.cdiv(K, tn),)

    # TODO(synk): at real FPN2MLP sizes (F_in=12544, rep=1024) add a K-dim grid
    # axis with a f32 VMEM accumulator and pipeline_mode=pl.Buffered(1) on the
    # grid-invariant weight operands so W1 fits v7x's 64 MiB VMEM.
    out = pl.pallas_call(
        _mlp_kernel,
        out_shape=jax.ShapeDtypeStruct((K, R_pad), jnp.float32),
        grid_spec=pltpu.PrefetchScalarGridSpec(
            num_scalar_prefetch=0,
            grid=grid,
            in_specs=[
                pl.BlockSpec((tn, F_pad), lambda i: (i, 0)),      # x rows tile
                pl.BlockSpec((F_pad, R_pad), lambda i: (0, 0)),   # W1 (resident)
                pl.BlockSpec((1, R_pad), lambda i: (0, 0)),       # b1
                pl.BlockSpec((R_pad, R_pad), lambda i: (0, 0)),   # W2 (resident)
                pl.BlockSpec((1, R_pad), lambda i: (0, 0)),       # b2
            ],
            out_specs=pl.BlockSpec((tn, R_pad), lambda i: (i, 0)),
        ),
        compiler_params=pltpu.CompilerParams(
            dimension_semantics=("parallel",)),
    )(xb, w1b, b1p, w2b, b2p)
    return out[:, :rep]


def fpn2mlp_feature_extractor_rnd(feats, proposals, params):
    """Forward pass of FPN2MLPFeatureExtractorRnd."""
    pooled = pooler_fn(feats, proposals)             # [K, C, R, R]
    x = pooled.reshape(pooled.shape[0], -1)          # [K, C*R*R]
    return mlp_head(x, params["w1"], params["b1"], params["w2"], params["b2"])


if __name__ == "__main__":
    key = jax.random.PRNGKey(0)
    k_feat, k_w1, k_w2 = jax.random.split(key, 3)

    # Feature map (single FPN level), NCHW.
    B, C, H, W = 2, 4, 16, 16
    feats = jax.random.normal(k_feat, (B, C, H, W), dtype=jnp.float32)

    # Proposals (image-space boxes; image size = H / scale = 64).
    boxes0 = jnp.array([[4.0, 4.0, 40.0, 40.0],
                        [8.0, 16.0, 56.0, 48.0],
                        [0.0, 0.0, 63.0, 63.0],
                        [20.0, 10.0, 30.0, 50.0]], dtype=jnp.float32)
    boxes1 = jnp.array([[2.0, 2.0, 20.0, 30.0],
                        [10.0, 5.0, 60.0, 60.0],
                        [30.0, 30.0, 50.0, 45.0],
                        [5.0, 40.0, 25.0, 62.0]], dtype=jnp.float32)
    proposals = [boxes0, boxes1]

    # Deterministic synthetic parameters (make_fc -> Linear; use_gn=False).
    input_size = C * POOLER_RESOLUTION ** 2
    rep = MLP_HEAD_DIM
    params = {
        "w1": jax.random.normal(k_w1, (input_size, rep), jnp.float32)
              * (2.0 / input_size) ** 0.5,
        "b1": jnp.zeros((1, rep), jnp.float32),
        "w2": jax.random.normal(k_w2, (rep, rep), jnp.float32)
              * (2.0 / rep) ** 0.5,
        "b2": jnp.zeros((1, rep), jnp.float32),
    }

    out = fpn2mlp_feature_extractor_rnd([feats], proposals, params)
    out = jax.block_until_ready(out)
    assert out.shape == (8, MLP_HEAD_DIM)

    # ---- Reference 1: gather-based ROIAlign vs. matmul pooler ---------------
    def _bilinear_sample(img, y, x):
        Cc, Hh, Ww = img.shape
        valid = (y > -1.0) & (y < Hh) & (x > -1.0) & (x < Ww)
        y = jnp.clip(y, 0.0, Hh - 1.0)
        x = jnp.clip(x, 0.0, Ww - 1.0)
        y0 = jnp.floor(y).astype(jnp.int32)
        x0 = jnp.floor(x).astype(jnp.int32)
        y1 = jnp.minimum(y0 + 1, Hh - 1)
        x1 = jnp.minimum(x0 + 1, Ww - 1)
        ly = y - y0.astype(y.dtype)
        lx = x - x0.astype(x.dtype)
        hy = 1.0 - ly
        hx = 1.0 - lx
        v00 = img[:, y0, x0]
        v01 = img[:, y0, x1]
        v10 = img[:, y1, x0]
        v11 = img[:, y1, x1]
        val = (hy * hx) * v00 + (hy * lx) * v01 + (ly * hx) * v10 + (ly * lx) * v11
        return jnp.where(valid[None], val, 0.0)

    def _roi_align_ref(img, box):
        R, S, sc = POOLER_RESOLUTION, SAMPLING_RATIO, POOLER_SCALES[0]
        x1, y1, x2, y2 = box * sc
        roi_w = jnp.maximum(x2 - x1, 1.0)
        roi_h = jnp.maximum(y2 - y1, 1.0)
        bw = roi_w / R
        bh = roi_h / R
        p = jnp.arange(R, dtype=jnp.float32)
        s = (jnp.arange(S, dtype=jnp.float32) + 0.5) / S
        ys = y1 + (p[:, None] + s[None, :]) * bh
        xs = x1 + (p[:, None] + s[None, :]) * bw
        yy = jnp.broadcast_to(ys[:, None, :, None], (R, R, S, S))
        xx = jnp.broadcast_to(xs[None, :, None, :], (R, R, S, S))
        return _bilinear_sample(img, yy, xx).mean(axis=(-1, -2))

    pooled = pooler_fn([feats], proposals)
    pooled_ref = jnp.concatenate([
        jax.vmap(lambda bx: _roi_align_ref(feats[b], bx))(boxes)
        for b, boxes in enumerate(proposals)], axis=0)
    assert jnp.allclose(pooled, pooled_ref, atol=1e-4, rtol=1e-4), \
        "matmul ROIAlign mismatch"

    # ---- Reference 2: bf16/f32-accum MLP from the same pooled features ------
    x_flat = pooled.reshape(pooled.shape[0], -1)
    xb = x_flat.astype(jnp.bfloat16)
    w1b = params["w1"].astype(jnp.bfloat16)
    w2b = params["w2"].astype(jnp.bfloat16)
    h = jnp.maximum(
        jnp.dot(xb, w1b, preferred_element_type=jnp.float32) + params["b1"], 0.0)
    ref = jnp.maximum(
        jnp.dot(h.astype(jnp.bfloat16), w2b, preferred_element_type=jnp.float32)
        + params["b2"], 0.0)
    assert jnp.allclose(out, ref, atol=1e-3, rtol=1e-3), "Pallas MLP mismatch"

    print("KERNEL_OK")
</pallas_src>

<mosaic_0001>
module attributes {stable_mosaic.version = 11 : i64} {
  func.func @_mlp_kernel(%arg0: i32, %arg1: memref<8x128xbf16, #tpu.memory_space<vmem>>, %arg2: memref<128x128xbf16, #tpu.memory_space<vmem>>, %arg3: memref<1x128xf32, #tpu.memory_space<vmem>>, %arg4: memref<128x128xbf16, #tpu.memory_space<vmem>>, %arg5: memref<1x128xf32, #tpu.memory_space<vmem>>, %arg6: memref<8x128xf32, #tpu.memory_space<vmem>>) attributes {dimension_semantics = [#tpu.dimension_semantics<parallel>], iteration_bounds = array<i64: 1>, scalar_prefetch = 0 : i64, scratch_operands = 0 : i64, tpu.core_type = #tpu.core_type<tc>, window_params = [{transform_indices = @transform_0, window_bounds = array<i64: 8, 128>}, {pipeline_mode = #tpu.pipeline_mode<synchronous>, transform_indices = @transform_1, window_bounds = array<i64: 128, 128>}, {pipeline_mode = #tpu.pipeline_mode<synchronous>, transform_indices = @transform_2, window_bounds = array<i64: 1, 128>}, {pipeline_mode = #tpu.pipeline_mode<synchronous>, transform_indices = @transform_3, window_bounds = array<i64: 128, 128>}, {pipeline_mode = #tpu.pipeline_mode<synchronous>, transform_indices = @transform_4, window_bounds = array<i64: 1, 128>}, {transform_indices = @transform_5, window_bounds = array<i64: 8, 128>}]} {
    %c0 = arith.constant 0 : index
    %c0_0 = arith.constant 0 : index
    %0 = vector.load %arg1[%c0, %c0_0] : memref<8x128xbf16, #tpu.memory_space<vmem>>, vector<8x128xbf16>
    %c0_1 = arith.constant 0 : index
    %c0_2 = arith.constant 0 : index
    %1 = vector.load %arg2[%c0_1, %c0_2] : memref<128x128xbf16, #tpu.memory_space<vmem>>, vector<128x128xbf16>
    %cst = arith.constant dense<0.000000e+00> : vector<8x128xf32>
    %2 = tpu.matmul %0, %1, %cst {dimension_numbers = #tpu.dot_dimension_numbers<[1], [0], [0], [1], [0, 0, 1, 1], [], []>} : vector<8x128xbf16>, vector<128x128xbf16>, vector<8x128xf32> -> vector<8x128xf32>
    %c0_3 = arith.constant 0 : index
    %c0_4 = arith.constant 0 : index
    %3 = vector.load %arg3[%c0_3, %c0_4] : memref<1x128xf32, #tpu.memory_space<vmem>>, vector<1x128xf32>
    %4 = vector.broadcast %3 : vector<1x128xf32> to vector<8x128xf32>
    %5 = arith.addf %2, %4 : vector<8x128xf32>
    %cst_5 = arith.constant 0.000000e+00 : f32
    %6 = vector.broadcast %cst_5 : f32 to vector<8x128xf32>
    %7 = arith.maximumf %5, %6 : vector<8x128xf32>
    %8 = arith.truncf %7 : vector<8x128xf32> to vector<8x128xbf16>
    %c0_6 = arith.constant 0 : index
    %c0_7 = arith.constant 0 : index
    %9 = vector.load %arg4[%c0_6, %c0_7] : memref<128x128xbf16, #tpu.memory_space<vmem>>, vector<128x128xbf16>
    %cst_8 = arith.constant dense<0.000000e+00> : vector<8x128xf32>
    %10 = tpu.matmul %8, %9, %cst_8 {dimension_numbers = #tpu.dot_dimension_numbers<[1], [0], [0], [1], [0, 0, 1, 1], [], []>} : vector<8x128xbf16>, vector<128x128xbf16>, vector<8x128xf32> -> vector<8x128xf32>
    %c0_9 = arith.constant 0 : index
    %c0_10 = arith.constant 0 : index
    %11 = vector.load %arg5[%c0_9, %c0_10] : memref<1x128xf32, #tpu.memory_space<vmem>>, vector<1x128xf32>
    %12 = vector.broadcast %11 : vector<1x128xf32> to vector<8x128xf32>
    %13 = arith.addf %10, %12 : vector<8x128xf32>
    %cst_11 = arith.constant 0.000000e+00 : f32
    %14 = vector.broadcast %cst_11 : f32 to vector<8x128xf32>
    %15 = arith.maximumf %13, %14 : vector<8x128xf32>
    %c0_12 = arith.constant 0 : index
    %c0_13 = arith.constant 0 : index
    %16 = vector.load %arg6[%c0_12, %c0_13] : memref<8x128xf32, #tpu.memory_space<vmem>>, vector<8x128xf32>
    tpu.vector_store %arg6[%c0_12, %c0_13], %15 {strides = array<i32>} : memref<8x128xf32, #tpu.memory_space<vmem>>, vector<8x128xf32>,
    return
  }
  func.func @transform_0(%arg0: i32) -> (i32, i32) {
    %c0_i32 = arith.constant 0 : i32
    %c0_i32_0 = arith.constant 0 : i32
    return %arg0, %c0_i32 : i32, i32
  }
  func.func @transform_1(%arg0: i32) -> (i32, i32) {
    %c0_i32 = arith.constant 0 : i32
    %c0_i32_0 = arith.constant 0 : i32
    %c0_i32_1 = arith.constant 0 : i32
    return %c0_i32, %c0_i32_0 : i32, i32
  }
  func.func @transform_2(%arg0: i32) -> (i32, i32) {
    %c0_i32 = arith.constant 0 : i32
    %c0_i32_0 = arith.constant 0 : i32
    %c0_i32_1 = arith.constant 0 : i32
    return %c0_i32, %c0_i32_0 : i32, i32
  }
  func.func @transform_3(%arg0: i32) -> (i32, i32) {
    %c0_i32 = arith.constant 0 : i32
    %c0_i32_0 = arith.constant 0 : i32
    %c0_i32_1 = arith.constant 0 : i32
    return %c0_i32, %c0_i32_0 : i32, i32
  }
  func.func @transform_4(%arg0: i32) -> (i32, i32) {
    %c0_i32 = arith.constant 0 : i32
    %c0_i32_0 = arith.constant 0 : i32
    %c0_i32_1 = arith.constant 0 : i32
    return %c0_i32, %c0_i32_0 : i32, i32
  }
  func.func @transform_5(%arg0: i32) -> (i32, i32) {
    %c0_i32 = arith.constant 0 : i32
    %c0_i32_0 = arith.constant 0 : i32
    return %arg0, %c0_i32 : i32, i32
  }
}

</mosaic_0001>

<bundles_post_ra>
// kernel: tpu_custom_call.1
= control target key start
LH: loop header
LB: loop body
LE: loop exit
PB: predicated region body
PF: predicated region fallthrough
CT: control target
= control target key end

     0   :  { %10 = vsyncpa [#allocation3], 0  ;;  %s596_s0 = inlined_call_operand.hbm [shape: bf16[8,128], index: 0, kind: input, shape index: {}]   ;;  %s597_s1 = inlined_call_operand.hbm [shape: bf16[128,128], index: 1, kind: input, shape index: {}]   ;;  %s598_s2 = inlined_call_operand.vmem [shape: f32[1,128], index: 2, kind: input, shape index: {}]   ;;  %s599_s3 = inlined_call_operand.hbm [shape: bf16[128,128], index: 3, kind: input, shape index: {}]   ;;  %s600_s4 = inlined_call_operand.vmem [shape: f32[1,128], index: 4, kind: input, shape index: {}]   ;;  %s601_s5 = inlined_call_operand.hbm [shape: f32[8,128], index: 5, kind: output, shape index: {}]  }
   0x1   :  { %11 = vsyncpa [#allocation6], 0 }
   0x2   :  { %12 = vsyncpa [#allocation4], 0  ;;  %s498_s18 = smov [#allocation5]   ;;  %s404_s22 = scalar_lea.hbm %s597_s1, 1024 }
   0x3   :  { %s28_s19 = sshll.u32 %s498_s18, 4  ;;  %p405_p0 = scmp.ne.s32.totalorder %s597_s1, %s404_s22  ;;  %s29_s19 = int_to_ptr.vmem [resolvable:$true] %s28_s19 }
   0x4   :  { %p408_p1 = scmp.lt.u32.totalorder %s404_s22, %s597_s1 }
   0x6   :  { %p410_p2 = pnand %p408_p1, %p405_p0 }
   0x8   :  { %413 = shalt.err (!%p410_p2)
}
   0x9   :  { %s414_s27 = scalar_lea.vmem %s29_s19, 1024  ;;  %p419_p4 = scmp.lt.s32.totalorder %s29_s19, %s29_s19 }
   0xa   :  { %p415_p3 = scmp.ne.s32.totalorder %s29_s19, %s414_s27  ;;  %p420_p5 = scmp.lt.s32.totalorder %s414_s27, %s414_s27 }
   0xc   :  { %p421_p6 = por %p420_p5, %p419_p4 }
   0xe   :  { %p422_p7 = pnand %p421_p6, %p415_p3 }
  0x10   :  { %425 = shalt.err (!%p422_p7)
}
  0x11   :  { %s499_s28 = smov 64   ;;  %s500_s29 = smov 4  }
  0x12   :  { %34 = dma.hbm_to_vmem [thread:$0]  %s597_s1, 1024, %s29_s19, [#allocation6], %s499_s28, %s499_s28, %s500_s29  }
  0x13   :  { %s501_s7 = smov [#allocation2]   ;;  %s502_s9 = smov [#allocation7]  }
  0x14   :  { %s19_s8 = sshll.u32 %s501_s7, 4  ;;  %s42_s10 = sshll.u32 %s502_s9, 4  ;;  %s20_s8 = int_to_ptr.vmem [resolvable:$true] %s19_s8  ;;  %s43_s10 = int_to_ptr.vmem [resolvable:$true] %s42_s10 }
  0x15   :  { %s426_s13 = scalar_lea.hbm %s596_s0, 64 }
  0x16   :  { %p427_p8 = scmp.ne.s32.totalorder %s596_s0, %s426_s13  ;;  %p430_p9 = scmp.lt.u32.totalorder %s426_s13, %s596_s0 }
  0x18   :  { %p432_p10 = pnand %p430_p9, %p427_p8 }
  0x1a   :  { %435 = shalt.err (!%p432_p10)
}
  0x1b   :  { %s436_s1 = scalar_lea.vmem %s20_s8, 64  ;;  %p441_p12 = scmp.lt.s32.totalorder %s20_s8, %s20_s8 }
  0x1c   :  { %p437_p11 = scmp.ne.s32.totalorder %s20_s8, %s436_s1  ;;  %p442_p13 = scmp.lt.s32.totalorder %s436_s1, %s436_s1 }
  0x1e   :  { %p443_p0 = por %p442_p13, %p441_p12 }
  0x20   :  { %p444_p1 = pnand %p443_p0, %p437_p11 }
  0x22   :  { %447 = shalt.err (!%p444_p1)
}
  0x23   :  { %22 = dma.hbm_to_vmem [thread:$0]  %s596_s0, 64, %s20_s8, [#allocation3]  }
  0x24   :  { %s448_s22 = scalar_lea.hbm %s599_s3, 1024 }
  0x25   :  { %p449_p2 = scmp.ne.s32.totalorder %s599_s3, %s448_s22  ;;  %p452_p3 = scmp.lt.u32.totalorder %s448_s22, %s599_s3 }
  0x27   :  { %p454_p4 = pnand %p452_p3, %p449_p2 }
  0x29   :  { %457 = shalt.err (!%p454_p4)
}
  0x2a   :  { %s458_s27 = scalar_lea.vmem %s43_s10, 1024  ;;  %p463_p6 = scmp.lt.s32.totalorder %s43_s10, %s43_s10 }
  0x2b   :  { %p459_p5 = scmp.ne.s32.totalorder %s43_s10, %s458_s27  ;;  %p464_p7 = scmp.lt.s32.totalorder %s458_s27, %s458_s27 }
  0x2d   :  { %p465_p8 = por %p464_p7, %p463_p6 }
  0x2f   :  { %p466_p9 = pnand %p465_p8, %p459_p5 }
  0x31   :  { %469 = shalt.err (!%p466_p9)
}
  0x32   :  { %48 = dma.hbm_to_vmem [thread:$0]  %s599_s3, 1024, %s43_s10, [#allocation6], %s499_s28, %s499_s28, %s500_s29  }
  0x33   :  { %492 = dma.done.wait [#allocation3], 64  }
  0x34   :  { %493 = vsyncadd [#allocation3], 4294967232 }
  0x35   :  { %494 = dma.done.wait [#allocation6], 2048  }
  0x36   :  { %495 = vsyncadd [#allocation6], 4294965248  ;;  %v503_v0 = vmov 0.0   ;;  %vm504_vm0 = vmmov 0   ;;  %v388_v1 = vld [vmem:[#allocation5] sm:$0xff]   ;;  %v389_v2 = vld [vmem:[#allocation5 + $0x8] sm:$0xff]  }
  0x37   :  { %340 = vmatprep.subr.bf16.mxu0 %v503_v0  ;;  %356 = vmatprep.mubr.msk.bf16.mxu0 %vm504_vm0, %v503_v0  ;;  %v390_v3 = vld [vmem:[#allocation5 + $0x10] sm:$0xff]   ;;  %v396_v4 = vld [vmem:[#allocation7] sm:$0xff]   ;;  %v391_v5 = vld [vmem:[#allocation5 + $0x18] sm:$0xff]   ;;  %s505_s7 = smov [#allocation8]  }
  0x38   :  { %360 = vmatprep.subr.bf16.mxu1 %v503_v0  ;;  %376 = vmatprep.mubr.msk.bf16.mxu1 %vm504_vm0, %v503_v0  ;;  %v397_v6 = vld [vmem:[#allocation7 + $0x8] sm:$0xff]   ;;  %v392_v7 = vld [vmem:[#allocation5 + $0x20] sm:$0xff]   ;;  %v398_v8 = vld [vmem:[#allocation7 + $0x10] sm:$0xff]   ;;  %s294_s8 = sshll.u32 %s505_s7, 4  ;;  %s295_s8 = int_to_ptr.vmem [resolvable:$true] %s294_s8 }
  0x39   :  { %341 = vmatpush3.bf16.msra.mxu0 %v388_v1  ;;  %361 = vmatpush3.bf16.msra.mxu1 %v396_v4  ;;  %v393_v9 = vld [vmem:[#allocation5 + $0x28] sm:$0xff]   ;;  %v399_v10 = vld [vmem:[#allocation7 + $0x18] sm:$0xff]   ;;  %v394_v11 = vld [vmem:[#allocation5 + $0x30] sm:$0xff]   ;;  %p475_p11 = scmp.lt.s32.totalorder %s295_s8, %s295_s8 }
  0x3a   :  { %342 = vmatprep.subr.bf16.mxu0 %v503_v0  ;;  %362 = vmatprep.subr.bf16.mxu1 %v503_v0  ;;  %v400_v12 = vld [vmem:[#allocation7 + $0x20] sm:$0xff]   ;;  %v395_v13 = vld [vmem:[#allocation5 + $0x38] sm:$0xff]   ;;  %v401_v14 = vld [vmem:[#allocation7 + $0x28] sm:$0xff]  }
  0x3b   :  { %v61_v15 = vld [vmem:[#allocation2] sm:$0xf]  ;;  %v402_v16 = vld [vmem:[#allocation7 + $0x30] sm:$0xff]  }
  0x3c   :  { %v403_v17 = vld [vmem:[#allocation7 + $0x38] sm:$0xff]  }
  0x3d   :  { %343 = vmatpush3.bf16.msra.mxu0 %v389_v2  ;;  %363 = vmatpush3.bf16.msra.mxu1 %v397_v6  ;;  %v304_v18 = vld [vmem:[%s598_s2] ss:$0 sm:$0xff]  ;;  %s470_s2 = scalar_lea.vmem %s295_s8, 128 }
  0x3e   :  { %344 = vmatprep.subr.bf16.mxu0 %v503_v0  ;;  %364 = vmatprep.subr.bf16.mxu1 %v503_v0  ;;  %v313_v26 = vld [vmem:[%s600_s4] ss:$0 sm:$0xff]  ;;  %p471_p10 = scmp.ne.s32.totalorder %s295_s8, %s470_s2  ;;  %p476_p12 = scmp.lt.s32.totalorder %s470_s2, %s470_s2 }
  0x40   :  { %p477_p13 = por %p476_p12, %p475_p11 }
  0x41   :  { %345 = vmatpush3.bf16.msra.mxu0 %v390_v3  ;;  %365 = vmatpush3.bf16.msra.mxu1 %v398_v8 }
  0x42   :  { %346 = vmatprep.subr.bf16.mxu0 %v503_v0  ;;  %366 = vmatprep.subr.bf16.mxu1 %v503_v0  ;;  %p478_p0 = pnand %p477_p13, %p471_p10 }
  0x45   :  { %347 = vmatpush3.bf16.msra.mxu0 %v391_v5  ;;  %367 = vmatpush3.bf16.msra.mxu1 %v399_v10 }
  0x46   :  { %348 = vmatprep.subr.bf16.mxu0 %v503_v0  ;;  %368 = vmatprep.subr.bf16.mxu1 %v503_v0 }
  0x49   :  { %349 = vmatpush3.bf16.msra.mxu0 %v392_v7  ;;  %369 = vmatpush3.bf16.msra.mxu1 %v400_v12 }
  0x4a   :  { %350 = vmatprep.subr.bf16.mxu0 %v503_v0  ;;  %370 = vmatprep.subr.bf16.mxu1 %v503_v0 }
  0x4d   :  { %351 = vmatpush3.bf16.msra.mxu0 %v393_v9  ;;  %371 = vmatpush3.bf16.msra.mxu1 %v401_v14 }
  0x4e   :  { %352 = vmatprep.subr.bf16.mxu0 %v503_v0  ;;  %372 = vmatprep.subr.bf16.mxu1 %v503_v0 }
  0x51   :  { %353 = vmatpush3.bf16.msra.mxu0 %v394_v11  ;;  %373 = vmatpush3.bf16.msra.mxu1 %v402_v16 }
  0x52   :  { %354 = vmatprep.subr.bf16.mxu0 %v503_v0  ;;  %374 = vmatprep.subr.bf16.mxu1 %v503_v0 }
  0x55   :  { %355 = vmatpush3.bf16.msra.mxu0 %v395_v13  ;;  %375 = vmatpush3.bf16.msra.mxu1 %v403_v17 }
  0x58   :  { %357 = vmatmul.mubr.bf16.vlgmr.msra.gmra.mrb[0].mxu0 %v61_v15 }
 0x12b   :  { %v167_v19 = vpop.f32.mrb[0].mxu0 }
 0x12c   :  { %v168_v20 = vadd.f32 %v304_v18, %v167_v19  ;;  %v358_v21 = vpop.f32.mrb[1].mxu0 }
 0x12d   :  { %v170_v22 = vpop.f32.mrb[2].mxu0 }
 0x12e   :  { %v173_v23 = vmax.f32 %v168_v20, 0.0  ;;  %v359_v24 = vpop.f32.mrb[3].mxu0 }
 0x130   :  { %v174_v25 = vpack.c.bf16 %v173_v23, %v173_v23 }
 0x132   :  { %377 = vmatmul.mubr.bf16.vlgmr.msra.gmra.mrb[0].mxu1 %v174_v25 }
 0x205   :  { %v280_v27 = vpop.f32.mrb[0].mxu1 }
 0x206   :  { %v281_v28 = vadd.f32 %v313_v26, %v280_v27  ;;  %v378_v29 = vpop.f32.mrb[1].mxu1 }
 0x207   :  { %v283_v30 = vpop.f32.mrb[2].mxu1 }
 0x208   :  { %v286_v31 = vmax.f32 %v281_v28, 0.0  ;;  %v379_v32 = vpop.f32.mrb[3].mxu1 }
 0x20a   :  { %287 = vst [vmem:[#allocation8] sm:$0xff] %v286_v31 }
 0x20b   :  { %481 = shalt.err (!%p478_p0)
}
 0x20c   :  { %s482_s4 = scalar_lea.hbm %s601_s5, 128 }
 0x20d   :  { %p483_p1 = scmp.ne.s32.totalorder %s601_s5, %s482_s4  ;;  %p486_p2 = scmp.lt.u32.totalorder %s482_s4, %s601_s5 }
 0x20f   :  { %p488_p3 = pnand %p486_p2, %p483_p1 }
 0x211   :  { %491 = shalt.err (!%p488_p3)
}
 0x212   :  { %297 = dma.vmem_to_hbm [thread:$0]  %s295_s8, 128, %s601_s5, [#allocation4]  }
 0x213   :  { %496 = dma.done.wait [#allocation4], 128  }
 0x214   :  { %497 = vsyncadd [#allocation4], 4294967168 }
 0x215   :  { %301 = vsyncpa [#allocation3], 1 }
 0x216   :  { %302 = vsyncpa [#allocation6], 1 }
 0x217   :  { %303 = vsyncpa [#allocation4], 1 }

</bundles_post_ra>
